<compile_context>
chip_gen: v6e
topology: v6e:2x2x1
jax: 0.10.0
libtpu: 0.0.40
codegen_flags: <defaults>
</compile_context>

<pallas_src>
import functools

import jax
import jax.numpy as jnp
from jax import lax
from jax.experimental import pallas as pl
from jax.experimental.pallas import tpu as pltpu


_VMEM_BUDGET = 32 * 1024 * 1024      # per-step tile working-set budget (fits v7x)
_VMEM_LIMIT_CAP = 48 * 1024 * 1024   # scoped-vmem request ceiling (< 64 MiB phys)


def _sdpa_kernel(*refs, inv_temperature, has_mask):
    if has_mask:
        q_ref, k_ref, v_ref, mask_ref, out_ref, attn_ref = refs
    else:
        q_ref, k_ref, v_ref, out_ref, attn_ref = refs

    # Blocks carry a leading batch dim of 1; index it away.  Operands keep
    # their native dtype so bf16 inputs use the fast MXU path.
    q = q_ref[0]                       # (TQ, Dk)
    k = k_ref[0]                       # (Lk, Dk)
    v = v_ref[0]                       # (Lk, Dv)

    # Fold 1/temperature into q: touches TQ*Dk elements instead of TQ*Lk.
    q = q * inv_temperature

    # scores = q @ k^T, contracting both trailing dims directly so Mosaic can
    # feed k in its natural (Lk, Dk) layout (no transpose / extra VMEM copy).
    scores = lax.dot_general(
        q, k,
        dimension_numbers=(((1,), (1,)), ((), ())),
        preferred_element_type=jnp.float32,
    )                                  # (TQ, Lk) f32

    if has_mask:
        m = mask_ref[0]                # (TQ, Lk) int8; nonzero == masked out
        scores = jnp.where(m != 0, -jnp.inf, scores)

    # Numerically stable softmax over the key axis, in f32.
    row_max = jnp.max(scores, axis=-1, keepdims=True)
    exps = jnp.exp(scores - row_max)
    denom = jnp.sum(exps, axis=-1, keepdims=True)
    # One reciprocal per query row + a VPU multiply over (TQ, Lk) instead of
    # (TQ, Lk) divides.  (approx=True would push it onto the EUP at ~1e-4
    # relative error; exact reciprocal keeps the f32 softmax tight.)
    attn = exps * pl.reciprocal(denom, approx=False)

    # out = attn @ v on the MXU, operands in v's dtype, f32 accumulation.
    out = jnp.dot(attn.astype(v.dtype), v, preferred_element_type=jnp.float32)

    attn_ref[0] = attn.astype(attn_ref.dtype)
    out_ref[0] = out.astype(out_ref.dtype)


def _vmem_estimate(tq, lk, dk, dv, q_item, k_item, v_item, attn_item, has_mask):
    """Rough per-step VMEM footprint: double-buffered blocks + f32 temporaries."""
    out_item = q_item
    blocks = 2 * (tq * dk * q_item          # q tile
                  + lk * dk * k_item        # full-K keys
                  + lk * dv * v_item        # full-K values
                  + tq * dv * out_item      # output tile
                  + tq * lk * attn_item)    # attn tile
    if has_mask:
        blocks += 2 * tq * lk               # int8 mask tile
    temps = 3 * tq * lk * 4 + 2 * tq * dk * 4   # scores/exps/attn + scaled q (f32)
    return blocks + temps


def _pick_query_tile(lq, lk, dk, dv, q_item, k_item, v_item, attn_item, has_mask):
    """Largest multiple-of-8 query tile whose working set fits the VMEM budget."""
    for tq in (1024, 512, 256, 128, 64, 32, 16, 8):
        if tq > lq:
            continue
        if _vmem_estimate(tq, lk, dk, dv, q_item, k_item, v_item, attn_item,
                          has_mask) <= _VMEM_BUDGET:
            return tq
    return min(lq, 8)


def scaled_dot_product_attention(q, k, v, mask=None, *, temperature):
    """Pallas implementation of ScaledDotProductAttention.forward."""
    B, Lq, Dk = q.shape
    Bk, Lk, Dk_k = k.shape
    Bv, Lk_v, Dv = v.shape
    assert (Bk, Dk_k) == (B, Dk) and (Bv, Lk_v) == (B, Lk)

    has_mask = mask is not None
    inv_temperature = 1.0 / float(temperature)
    attn_dtype = q.dtype

    q_item = jnp.dtype(q.dtype).itemsize
    k_item = jnp.dtype(k.dtype).itemsize
    v_item = jnp.dtype(v.dtype).itemsize
    attn_item = jnp.dtype(attn_dtype).itemsize

    tq = _pick_query_tile(Lq, Lk, Dk, Dv, q_item, k_item, v_item, attn_item,
                          has_mask)
    n_q = pl.cdiv(Lq, tq)

    in_specs = [
        pl.BlockSpec((1, tq, Dk), lambda b, i: (b, i, 0)),   # q tile
        pl.BlockSpec((1, Lk, Dk), lambda b, i: (b, 0, 0)),   # k: batch-only index
        pl.BlockSpec((1, Lk, Dv), lambda b, i: (b, 0, 0)),   # v: batch-only index
    ]
    inputs = [q, k, v]
    if has_mask:
        assert mask.shape == (B, Lq, Lk)
        in_specs.append(pl.BlockSpec((1, tq, Lk), lambda b, i: (b, i, 0)))
        inputs.append(mask.astype(jnp.int8))                 # 4x less HBM than int32

    out_specs = [
        pl.BlockSpec((1, tq, Dv), lambda b, i: (b, i, 0)),
        pl.BlockSpec((1, tq, Lk), lambda b, i: (b, i, 0)),
    ]
    out_shape = (
        jax.ShapeDtypeStruct((B, Lq, Dv), q.dtype),
        jax.ShapeDtypeStruct((B, Lq, Lk), attn_dtype),
    )

    est = _vmem_estimate(tq, Lk, Dk, Dv, q_item, k_item, v_item, attn_item,
                         has_mask)
    vmem_limit = int(min(_VMEM_LIMIT_CAP, max(32 * 1024 * 1024, est + est // 4)))

    kernel = functools.partial(
        _sdpa_kernel, inv_temperature=inv_temperature, has_mask=has_mask)

    grid_spec = pltpu.PrefetchScalarGridSpec(
        num_scalar_prefetch=0,
        grid=(B, n_q),
        in_specs=in_specs,
        out_specs=out_specs,
    )

    out, attn = pl.pallas_call(
        kernel,
        grid_spec=grid_spec,
        out_shape=out_shape,
        compiler_params=pltpu.CompilerParams(
            dimension_semantics=("parallel", "parallel"),
            vmem_limit_bytes=vmem_limit,
        ),
    )(*inputs)
    return out, attn


def _reference(q, k, v, mask, temperature):
    attn = jnp.einsum("bqd,bkd->bqk", q, k) / temperature
    if mask is not None:
        attn = jnp.where(mask, -jnp.inf, attn)
    attn = jax.nn.softmax(attn, axis=2)
    out = jnp.einsum("bqk,bkd->bqd", attn, v)
    return out, attn


if __name__ == "__main__":
    key = jax.random.PRNGKey(0)
    B, Lq, Lk, Dk, Dv = 2, 8, 8, 32, 32
    temperature = float(Dk) ** 0.5

    kq, kk, kv, km = jax.random.split(key, 4)
    q = jax.random.normal(kq, (B, Lq, Dk), dtype=jnp.float32)
    k = jax.random.normal(kk, (B, Lk, Dk), dtype=jnp.float32)
    v = jax.random.normal(kv, (B, Lk, Dv), dtype=jnp.float32)
    # Random boolean mask (True == masked out); never mask key 0 so every
    # query row keeps at least one visible key.
    mask = jax.random.bernoulli(km, p=0.3, shape=(B, Lq, Lk))
    mask = mask.at[:, :, 0].set(False)

    # Masked path.
    out, attn = scaled_dot_product_attention(q, k, v, mask, temperature=temperature)
    out = jax.block_until_ready(out)
    attn = jax.block_until_ready(attn)
    ref_out, ref_attn = _reference(q, k, v, mask, temperature)
    assert jnp.allclose(out, ref_out, atol=1e-5, rtol=1e-5)
    assert jnp.allclose(attn, ref_attn, atol=1e-5, rtol=1e-5)

    # No-mask path (separate kernel variant: no mask DMA, no select).
    out_nm, attn_nm = scaled_dot_product_attention(q, k, v, None,
                                                   temperature=temperature)
    out_nm = jax.block_until_ready(out_nm)
    attn_nm = jax.block_until_ready(attn_nm)
    ref_out_nm, ref_attn_nm = _reference(q, k, v, None, temperature)
    assert jnp.allclose(out_nm, ref_out_nm, atol=1e-5, rtol=1e-5)
    assert jnp.allclose(attn_nm, ref_attn_nm, atol=1e-5, rtol=1e-5)

    print("KERNEL_OK")
</pallas_src>

<mosaic_0001>
module attributes {stable_mosaic.version = 11 : i64} {
  func.func @_sdpa_kernel(%arg0: i32, %arg1: i32, %arg2: memref<1x8x32xf32, #tpu.memory_space<vmem>>, %arg3: memref<1x8x32xf32, #tpu.memory_space<vmem>>, %arg4: memref<1x8x32xf32, #tpu.memory_space<vmem>>, %arg5: memref<1x8x8xi8, #tpu.memory_space<vmem>>, %arg6: memref<1x8x32xf32, #tpu.memory_space<vmem>>, %arg7: memref<1x8x8xf32, #tpu.memory_space<vmem>>) attributes {dimension_semantics = [#tpu.dimension_semantics<parallel>, #tpu.dimension_semantics<parallel>], iteration_bounds = array<i64: 2, 1>, scalar_prefetch = 0 : i64, scratch_operands = 0 : i64, tpu.core_type = #tpu.core_type<tc>, window_params = [{transform_indices = @transform_0, window_bounds = array<i64: 1, 8, 32>}, {transform_indices = @transform_1, window_bounds = array<i64: 1, 8, 32>}, {transform_indices = @transform_2, window_bounds = array<i64: 1, 8, 32>}, {transform_indices = @transform_3, window_bounds = array<i64: 1, 8, 8>}, {transform_indices = @transform_4, window_bounds = array<i64: 1, 8, 32>}, {transform_indices = @transform_5, window_bounds = array<i64: 1, 8, 8>}]} {
    %c0 = arith.constant 0 : index
    %c0_0 = arith.constant 0 : index
    %c0_1 = arith.constant 0 : index
    %0 = vector.load %arg2[%c0, %c0_0, %c0_1] : memref<1x8x32xf32, #tpu.memory_space<vmem>>, vector<1x8x32xf32>
    %1 = vector.shape_cast %0 : vector<1x8x32xf32> to vector<8x32xf32>
    %c0_2 = arith.constant 0 : index
    %c0_3 = arith.constant 0 : index
    %c0_4 = arith.constant 0 : index
    %2 = vector.load %arg3[%c0_2, %c0_3, %c0_4] : memref<1x8x32xf32, #tpu.memory_space<vmem>>, vector<1x8x32xf32>
    %3 = vector.shape_cast %2 : vector<1x8x32xf32> to vector<8x32xf32>
    %c0_5 = arith.constant 0 : index
    %c0_6 = arith.constant 0 : index
    %c0_7 = arith.constant 0 : index
    %4 = vector.load %arg4[%c0_5, %c0_6, %c0_7] : memref<1x8x32xf32, #tpu.memory_space<vmem>>, vector<1x8x32xf32>
    %5 = vector.shape_cast %4 : vector<1x8x32xf32> to vector<8x32xf32>
    %cst = arith.constant 0.176776692 : f32
    %6 = vector.broadcast %cst : f32 to vector<8x32xf32>
    %7 = arith.mulf %1, %6 : vector<8x32xf32>
    %cst_8 = arith.constant dense<0.000000e+00> : vector<8x8xf32>
    %8 = tpu.matmul %7, %3, %cst_8 {dimension_numbers = #tpu.dot_dimension_numbers<[1], [1], [0], [0], [0, 0, 1, 0], [], []>} : vector<8x32xf32>, vector<8x32xf32>, vector<8x8xf32> -> vector<8x8xf32>
    %c0_9 = arith.constant 0 : index
    %c0_10 = arith.constant 0 : index
    %c0_11 = arith.constant 0 : index
    %9 = vector.load %arg5[%c0_9, %c0_10, %c0_11] : memref<1x8x8xi8, #tpu.memory_space<vmem>>, vector<1x8x8xi8>
    %10 = vector.shape_cast %9 : vector<1x8x8xi8> to vector<8x8xi8>
    %c0_i8 = arith.constant 0 : i8
    %11 = vector.broadcast %c0_i8 : i8 to vector<8x8xi8>
    %12 = arith.cmpi ne, %10, %11 : vector<8x8xi8>
    %cst_12 = arith.constant 0xFF800000 : f32
    %13 = vector.broadcast %cst_12 : f32 to vector<8x8xf32>
    %14 = arith.select %12, %13, %8 : vector<8x8xi1>, vector<8x8xf32>
    %cst_13 = arith.constant dense<0xFF800000> : vector<8xf32>
    %15 = vector.multi_reduction <maximumf>, %14, %cst_13 [1] : vector<8x8xf32> to vector<8xf32>
    %16 = vector.shape_cast %15 : vector<8xf32> to vector<8x1xf32>
    %17 = vector.broadcast %16 : vector<8x1xf32> to vector<8x8xf32>
    %18 = arith.subf %14, %17 : vector<8x8xf32>
    %19 = math.exp %18 : vector<8x8xf32>
    %cst_14 = arith.constant dense<0.000000e+00> : vector<8xf32>
    %20 = vector.multi_reduction <add>, %19, %cst_14 [1] : vector<8x8xf32> to vector<8xf32>
    %21 = vector.shape_cast %20 : vector<8xf32> to vector<8x1xf32>
    %22 = tpu.reciprocal %21 : vector<8x1xf32> -> vector<8x1xf32>
    %23 = vector.broadcast %22 : vector<8x1xf32> to vector<8x8xf32>
    %24 = arith.mulf %19, %23 : vector<8x8xf32>
    %cst_15 = arith.constant dense<0.000000e+00> : vector<8x32xf32>
    %25 = tpu.matmul %24, %5, %cst_15 {dimension_numbers = #tpu.dot_dimension_numbers<[1], [0], [0], [1], [0, 0, 1, 1], [], []>} : vector<8x8xf32>, vector<8x32xf32>, vector<8x32xf32> -> vector<8x32xf32>
    %c0_16 = arith.constant 0 : index
    %c0_17 = arith.constant 0 : index
    %c0_18 = arith.constant 0 : index
    %26 = vector.load %arg7[%c0_16, %c0_17, %c0_18] : memref<1x8x8xf32, #tpu.memory_space<vmem>>, vector<1x8x8xf32>
    %27 = vector.shape_cast %26 : vector<1x8x8xf32> to vector<8x8xf32>
    %28 = vector.shape_cast %24 : vector<8x8xf32> to vector<1x8x8xf32>
    tpu.vector_store %arg7[%c0_16, %c0_17, %c0_18], %28 {strides = array<i32>} : memref<1x8x8xf32, #tpu.memory_space<vmem>>, vector<1x8x8xf32>,
    %c0_19 = arith.constant 0 : index
    %c0_20 = arith.constant 0 : index
    %c0_21 = arith.constant 0 : index
    %29 = vector.load %arg6[%c0_19, %c0_20, %c0_21] : memref<1x8x32xf32, #tpu.memory_space<vmem>>, vector<1x8x32xf32>
    %30 = vector.shape_cast %29 : vector<1x8x32xf32> to vector<8x32xf32>
    %31 = vector.shape_cast %25 : vector<8x32xf32> to vector<1x8x32xf32>
    tpu.vector_store %arg6[%c0_19, %c0_20, %c0_21], %31 {strides = array<i32>} : memref<1x8x32xf32, #tpu.memory_space<vmem>>, vector<1x8x32xf32>,
    return
  }
  func.func @transform_0(%arg0: i32, %arg1: i32) -> (i32, i32, i32) {
    %c0_i32 = arith.constant 0 : i32
    %c0_i32_0 = arith.constant 0 : i32
    return %arg0, %arg1, %c0_i32 : i32, i32, i32
  }
  func.func @transform_1(%arg0: i32, %arg1: i32) -> (i32, i32, i32) {
    %c0_i32 = arith.constant 0 : i32
    %c0_i32_0 = arith.constant 0 : i32
    %c0_i32_1 = arith.constant 0 : i32
    return %arg0, %c0_i32, %c0_i32_0 : i32, i32, i32
  }
  func.func @transform_2(%arg0: i32, %arg1: i32) -> (i32, i32, i32) {
    %c0_i32 = arith.constant 0 : i32
    %c0_i32_0 = arith.constant 0 : i32
    %c0_i32_1 = arith.constant 0 : i32
    return %arg0, %c0_i32, %c0_i32_0 : i32, i32, i32
  }
  func.func @transform_3(%arg0: i32, %arg1: i32) -> (i32, i32, i32) {
    %c0_i32 = arith.constant 0 : i32
    %c0_i32_0 = arith.constant 0 : i32
    return %arg0, %arg1, %c0_i32 : i32, i32, i32
  }
  func.func @transform_4(%arg0: i32, %arg1: i32) -> (i32, i32, i32) {
    %c0_i32 = arith.constant 0 : i32
    %c0_i32_0 = arith.constant 0 : i32
    return %arg0, %arg1, %c0_i32 : i32, i32, i32
  }
  func.func @transform_5(%arg0: i32, %arg1: i32) -> (i32, i32, i32) {
    %c0_i32 = arith.constant 0 : i32
    %c0_i32_0 = arith.constant 0 : i32
    return %arg0, %arg1, %c0_i32 : i32, i32, i32
  }
}

</mosaic_0001>

<bundles_post_ra>
// kernel: tpu_custom_call.1
= control target key start
LH: loop header
LB: loop body
LE: loop exit
PB: predicated region body
PF: predicated region fallthrough
CT: control target
= control target key end

     0   :  { %s1355_s0 = inlined_call_operand.hbm [shape: f32[2,8,32], index: 0, kind: input, shape index: {}]   ;;  %s1356_s1 = inlined_call_operand.hbm [shape: f32[2,8,32], index: 1, kind: input, shape index: {}]   ;;  %s1357_s2 = inlined_call_operand.hbm [shape: f32[2,8,32], index: 2, kind: input, shape index: {}]   ;;  %s1358_s3 = inlined_call_operand.vmem [shape: s8[2,8,8], index: 3, kind: input, shape index: {}]   ;;  %s1359_s4 = inlined_call_operand.hbm [shape: f32[2,8,32], index: 4, kind: output, shape index: {0}]   ;;  %s1360_s5 = inlined_call_operand.hbm [shape: f32[2,8,8], index: 5, kind: output, shape index: {1}]  }
   0x1   :  { %1366 = sst [smem:[#allocation19_spill]] %s1356_s1 }
   0x2   :  { %11 = vsyncpa [#allocation3], 0 }
   0x3   :  { %13 = vsyncpa [#allocation3 + $0x1], 0 }
   0x4   :  { %14 = vsyncpa [#allocation6], 0 }
   0x5   :  { %16 = vsyncpa [#allocation6 + $0x1], 0 }
   0x6   :  { %17 = vsyncpa [#allocation4], 0 }
   0x7   :  { %19 = vsyncpa [#allocation4 + $0x1], 0 }
   0x8   :  { %20 = vsyncpa [#allocation10], 0 }
   0x9   :  { %22 = vsyncpa [#allocation10 + $0x1], 0  ;;  %s1112_s18 = smov 0   ;;  %s1114_s19 = smov 0  }
   0xa   :  { %s1116_s20 = smov 0   ;;  %s1118_s21 = smov 0  }
   0xb   :  { %s1120_s22 = smov 0   ;;  %s1122_s23 = smov 0  }
   0xc LB: > { %1367 = sst [smem:[#allocation15_spill]] %s1068_s22  ;;  %s1143_s24 = sadd.s32 4294967295, %s1072_s23   ;;  %s1072_s23 = sphi %s1122_s23, %s28_s23   ;;  %s1068_s22 = sphi %s1120_s22, %s1383_s22   ;;  %s1064_s21 = sphi %s1118_s21, %s1382_s21   ;;  %s1060_s20 = sphi %s1116_s20, %s1386_s20   ;;  %s1056_s19 = sphi %s1114_s19, %s1385_s19   ;;  %s1052_s18 = sphi %s1112_s18, %s1384_s18  }
   0xd   : > { %1368 = sst [smem:[#allocation16_spill]] %s1072_s23  ;;  %s751_s25 = sadd.s32 4294967294, %s1072_s23  }
   0xe   : > { %s40_s26 = sadd.s32 1, %s1068_s22  ;;  %s49_s27 = sadd.s32 1, %s1060_s20 }
   0xf   : > { %p42_p0 = scmp.ge.s32.totalorder %s40_s26, 2  ;;  %p56_p1 = scmp.ne.s32.totalorder %s1060_s20, %s1056_s19 }
  0x10   : > { %p57_p2 = scmp.eq.s32.totalorder %s1072_s23, 0  ;;  %p62_p3 = scmp.ne.s32.totalorder %s1056_s19, %s1052_s18 }
  0x11   : > { %s1388_s26 = smov (%p42_p0, %s40_s26), 0  ;;  %p63_p5 = scmp.eq.s32.totalorder %s1143_s24, 0 }
  0x12   : > { %1369 = sst [smem:[#allocation17_spill]] %s1388_s26  ;;  %p1155_p4 = por %p57_p2, %p56_p1 }
  0x13   : > { %s44_s29 = ssub.s32 %s1068_s22, %s1388_s26  ;;  %p168_p6 = scmp.eq.s32.totalorder %s1143_s24, 1 }
  0x14   : > { %p47_p7 = scmp.eq.s32.totalorder %s44_s29, 0  ;;  %p1163_p8 = por %p63_p5, %p62_p3 }
  0x15   : > { %p1167_p9 = por %p168_p6, %p56_p1  ;;  %p174_p10 = scmp.eq.s32.totalorder %s751_s25, 1 }
  0x16   : > { %s1172_s7 = scalar_select %p47_p7, %s1060_s20, %s49_s27  }
  0x17   : > { %p1174_p11 = por %p174_p10, %p62_p3  ;;  %p817_p13 = scmp.lt.s32.totalorder %s1072_s23, 2 }
  0x18   : > { %1373 = sst [smem:[#allocation18_spill]] %s1172_s7  ;;  %s1361_s9 = sand.u32 1, %s1060_s20  }
  0x19   : > { %s1183_s10 = sshll.u32 %s1361_s9, 3  ;;  %s1186_s11 = sshll.u32 %s1068_s22, 7 }
  0x1a   : > { %p1190_p0 = pnand %p817_p13, %p1155_p4  ;;  %s241_s13 = sand.u32 1, %s1072_s23  }
  0x1b   : > { %s1376_s1 = sld [smem:[#allocation19_spill]]  ;;  %s245_s17 = scalar_lea.vmem [#allocation5], %s1183_s10 }
  0x1c   : > { %s252_s25 = sshll.u32 %s245_s17, 4  ;;  %p760_p1 = scmp.ge.s32.totalorder %s1072_s23, 1  ;;  %s253_s25 = int_to_ptr.vmem [resolvable:$true] %s252_s25 }
  0x1d   : > { %p285_p2 = scmp.lt.s32.totalorder %s1072_s23, 3  ;;  %s1202_s27 = scalar_lea.sflag [#allocation6], %s241_s13 }
  0x1e   : > { %p876_p3 = pneg %p1190_p0  ;;  %s887_s28 = scalar_lea.vmem %s253_s25, 128 }
  0x1f   : > { %p888_p4 = scmp.ne.s32.totalorder %s253_s25, %s887_s28  ;;  %s1074_s29 = smov [#allocation5]  }
  0x20   : > { %s892_s9 = sshll.u32 %s1074_s29, 4  ;;  %s893_s9 = int_to_ptr.vmem [resolvable:$false] %s892_s9 }
  0x21   : > { %s250_s16 = scalar_lea.hbm %s1376_s1, %s1186_s11  ;;  %p890_p5 = pnand %p888_p4, %p876_p3 }
  0x22   : > { %s894_s14 = scalar_lea.vmem %s893_s9, 256  ;;  %p895_p7 = scmp.lt.s32.totalorder %s253_s25, %s893_s9 }
  0x23   : > { %p891_p6 = pneg %p890_p5  ;;  %p896_p10 = scmp.lt.s32.totalorder %s894_s14, %s887_s28 }
  0x25   : > { %p897_p13 = por %p896_p10, %p895_p7 }
  0x27   : > { %p898_p12 = pnand %p897_p13, %p891_p6 }
  0x29   : > { %901 = shalt.err (!%p898_p12)
}
  0x2a   : > { %806 = dma.hbm_to_vmem [thread:$0]  (!%p1190_p0), %s250_s16, 128, %s253_s25, %s1202_s27  }
  0x2b   : > { %p1216_p4 = pnand %p760_p1, %p285_p2  ;;  %s232_s17 = scalar_lea.hbm %s1355_s0, %s1186_s11 }
  0x2c   : > { %s226_s28 = scalar_lea.vmem [#allocation2], %s1183_s10  ;;  %s268_s26 = scalar_lea.hbm %s1357_s2, %s1186_s11 }
  0x2d   : > { %s234_s29 = sshll.u32 %s226_s28, 4  ;;  %s1378_s22 = sand.u32 1, %s1060_s20   ;;  %s235_s29 = int_to_ptr.vmem [resolvable:$true] %s234_s29 }
  0x2e   : > { %s223_s7 = scalar_lea.sflag [#allocation3], %s1378_s22  ;;  %s915_s16 = scalar_lea.vmem %s235_s29, 128 }
  0x2f   : > { %p916_p12 = scmp.ne.s32.totalorder %s235_s29, %s915_s16  ;;  %s1075_s25 = smov [#allocation2]  }
  0x30   : > { %s920_s23 = sshll.u32 %s1075_s25, 4  ;;  %s921_s23 = int_to_ptr.vmem [resolvable:$false] %s920_s23 }
  0x31   : > { %p918_p1 = pnand %p916_p12, %p876_p3  ;;  %s922_s9 = scalar_lea.vmem %s921_s23, 256 }
  0x32   : > { %p923_p5 = scmp.lt.s32.totalorder %s235_s29, %s921_s23  ;;  %p924_p6 = scmp.lt.s32.totalorder %s922_s9, %s915_s16 }
  0x33   : > { %p919_p2 = pneg %p918_p1 }
  0x34   : > { %p925_p7 = por %p924_p6, %p923_p5 }
  0x36   : > { %p926_p10 = pnand %p925_p7, %p919_p2 }
  0x38   : > { %929 = shalt.err (!%p926_p10)
}
  0x39   : > { %803 = dma.hbm_to_vmem [thread:$0]  (!%p1190_p0), %s232_s17, 128, %s235_s29, %s223_s7  }
  0x3a   : > { %s263_s1 = scalar_lea.vmem [#allocation7], %s1183_s10  ;;  %s1076_s28 = smov [#allocation7]  }
  0x3b   : > { %s270_s22 = sshll.u32 %s263_s1, 4  ;;  %s948_s23 = sshll.u32 %s1076_s28, 4  ;;  %s271_s22 = int_to_ptr.vmem [resolvable:$true] %s270_s22  ;;  %s949_s23 = int_to_ptr.vmem [resolvable:$false] %s948_s23 }
  0x3c   : > { %s943_s15 = scalar_lea.vmem %s271_s22, 128  ;;  %s950_s14 = scalar_lea.vmem %s949_s23, 256 }
  0x3d   : > { %p944_p13 = scmp.ne.s32.totalorder %s271_s22, %s943_s15  ;;  %p951_p2 = scmp.lt.s32.totalorder %s271_s22, %s949_s23 }
  0x3e   : > { %p952_p5 = scmp.lt.s32.totalorder %s950_s14, %s943_s15 }
  0x3f   : > { %p946_p12 = pnand %p944_p13, %p876_p3 }
  0x40   : > { %p953_p6 = por %p952_p5, %p951_p2 }
  0x41   : > { %p947_p1 = pneg %p946_p12 }
  0x43   : > { %p954_p7 = pnand %p953_p6, %p947_p1 }
  0x45   : > { %957 = shalt.err (!%p954_p7)
}
  0x46   : > { %809 = dma.hbm_to_vmem [thread:$0]  (!%p1190_p0), %s268_s26, 128, %s271_s22, %s1202_s27  }
  0x47   : > { %289 = sbr.rel (%p1216_p4) target bundleno = 799 (0x31f), region = 36  ;;  %s1251_s17 = sand.u32 (!%p1216_p4), 1, %s1056_s19  }
  0x48   : > { %s1254_s29 = sshll.u32 (!%p1216_p4), %s1251_s17, 3  ;;  %s292_s12 = scalar_lea.sflag (!%p1216_p4), [#allocation3], %s1251_s17 }
  0x49   : > { %s295_s16 = scalar_lea.vmem (!%p1216_p4), [#allocation2], %s1254_s29 }
  0x4c   : > { %1035 = dma.done.wait (%p1163_p8), %s292_s12, 128  }
  0x4d   : > { %1037 = vsyncadd (%p1163_p8), %s292_s12, 4294967168  ;;  %s300_s26 = sand.u32 1, %s1143_s24   ;;  %s304_s27 = scalar_lea.vmem [#allocation5], %s1254_s29 }
  0x4e   : > { %s301_s11 = scalar_lea.sflag [#allocation6], %s300_s26 }
  0x4f   : > { %1039 = dma.done.wait (%p1163_p8), %s301_s11, 256  }
  0x50   : > { %1041 = vsyncadd (%p1163_p8), %s301_s11, 4294967040  ;;  %v1077_v0 = vmov 0.0   ;;  %vm1078_vm0 = vmmov 0   ;;  %vm375_vm1 = vcmask 261120   ;;  %v372_v1 = vld [vmem:[%s304_s27] sm:$0xff]  ;;  %v371_v2 = vld [vmem:[%s295_s16] sm:$0xff] }
  0x51   : > { %780 = vmatprep.subr.mxu0 %v1077_v0  ;;  %782 = vmatprep.mubr.msk.f32.mxu0 %vm1078_vm0, %v1077_v0  ;;  %v374_v3 = vmul.f32 0.17677669, %v371_v2  ;;  %p362_p0 = scmp.lt.s32.totalorder %s1064_s21, 1  ;;  %v1079_v5 = vmov 0   ;;  %vm458_vm4 = vcmask 64512   ;;  %s313_s1 = scalar_lea.vmem [#allocation7], %s1254_s29 }
  0x52   : > { %785 = vmatprep.subr.mxu1 %v1077_v0  ;;  %787 = vmatprep.mubr.msk.f32.mxu1 %vm1078_vm0, %v1077_v0  ;;  %v373_v17 = vld [vmem:[%s313_s1] sm:$0xff]  ;;  %s361_s22 = scalar_lea.vmem [#allocation9], %s1254_s29  ;;  %s772_s15 = sshll.u32 %s1064_s21, 7 }
  0x53   : > { %781 = vmatpush3.xpose.msk.msra.mxu0 %vm375_vm1, %v372_v1  ;;  %s363_s24 = scalar_select %p362_p0, %s1064_s21, 1  ;;  %786 = vmatpush3.msra.mxu1 %v373_v17 }
  0x54   : > { %s577_s14 = scalar_lea.hbm %s1360_s5, %s772_s15  ;;  %s579_s7 = sshll.u32 %s361_s22, 4  ;;  %s580_s7 = int_to_ptr.vmem [resolvable:$true] %s579_s7 }
  0x55   : > { %s766_s30 = sshll.u32 %s363_s24, 1  ;;  %s551_s10 = scalar_lea.sflag [#allocation10], %s1251_s17 }
  0x56   : > { %783 = vmatmul.mubr.msk.f32.vlgmr.msra.gmra.mxu0 %vm375_vm1, %v374_v3  ;;  %s368_s9 = scalar_lea.vmem %s1358_s3, %s766_s30  ;;  %s958_s12 = scalar_lea.vmem %s580_s7, 128 }
  0x57   : > { %v452_v4 = vld [vmem:[%s368_s9] sm:$0x3]  ;;  %p959_p8 = scmp.ne.s32.totalorder %s580_s7, %s958_s12  ;;  %s1080_s16 = smov [#allocation9]  }
  0x58   : > { %vm453_vm2 = vnez %v452_v4  ;;  %s962_s26 = sshll.u32 %s1080_s16, 4  ;;  %s963_s26 = int_to_ptr.vmem [resolvable:$false] %s962_s26 }
  0x59   : > { %v454_v6 = vsel %vm453_vm2, 16843009, %v1079_v5  ;;  %p960_p3 = pnand %p959_p8, %p1167_p9  ;;  %s964_s11 = scalar_lea.vmem %s963_s26, 256 }
  0x5a   : > { %v455_v7 = vunpack.c.0.s8 %v454_v6  ;;  %p965_p10 = scmp.lt.s32.totalorder %s580_s7, %s963_s26  ;;  %p966_p13 = scmp.lt.s32.totalorder %s964_s11, %s958_s12 }
  0x5b   : > { %p961_p4 = pneg %p960_p3 }
  0x5c   : > { %vm456_vm3 = vcmp.ne.s32.totalorder %v455_v7, 0  ;;  %p967_p12 = por %p966_p13, %p965_p10 }
  0x5e   : > { %p968_p1 = pnand %p967_p12, %p961_p4 }
 0x116   : > { %v448_v8 = vpop.f32.mrf.mxu0 }
 0x117   : > { %v457_v9 = vsel %vm456_vm3, -inf, %v448_v8 }
 0x118   : > { %v784_v10 = vpop.f32.mrf.mxu0  ;;  %v459_v11 = vsel %vm458_vm4, %v457_v9, -inf }
 0x119   : > { %460 = vmax.xlane.f32.xlu0 %v459_v11 }
 0x1a2   : > { %v461_v12 = vpop.xlane.xlu0 %460 }
 0x1a3   : > { %v462_v13 = vsub.f32 %v457_v9, %v461_v12 }
 0x1a5   : > { %v463_v14 = vmul.f32 1.442695, %v462_v13 }
 0x1a7   : > { %870 = vpow2.f32 %v463_v14 }
 0x1b4   : > { %v871_v15 = vpop.eup %870 }
 0x1b5   : > { %v465_v16 = vsel %vm458_vm4, %v871_v15, 0.0 }
 0x1b6   : > { %466 = vadd.xlane.f32.xlu0 %v465_v16 }
 0x23f   : > { %v467_v18 = vpop.xlane.xlu0 %466 }
 0x240   : > { %872 = vrcp.f32 %v467_v18 }
 0x24d   : > { %v873_v19 = vpop.eup %872 }
 0x24e   : > { %v469_v20 = vmul.f32 %v873_v19, %v871_v15 }
 0x250   : > { %788 = vmatmul.mubr.msk.f32.vlgmr.msra.gmra.mxu1 %vm458_vm4, %v469_v20  ;;  %543 = vst.msk [vmem:[%s361_s22] sm:$0xff] %vm458_vm4, %v469_v20 }
 0x251   : > { %971 = shalt.err (!%p968_p1)
}
 0x252   : > { %s972_s27 = scalar_lea.hbm %s577_s14, 128  ;;  %s976_s13 = scalar_lea.hbm %s1360_s5, 256 }
 0x253   : > { %p973_p2 = scmp.ne.s32.totalorder %s577_s14, %s972_s27  ;;  %p977_p7 = scmp.lt.s32.totalorder %s577_s14, %s1360_s5 }
 0x254   : > { %p978_p0 = scmp.lt.s32.totalorder %s976_s13, %s972_s27 }
 0x255   : > { %p974_p5 = pnand %p973_p2, %p1167_p9 }
 0x256   : > { %p979_p8 = por %p978_p0, %p977_p7 }
 0x257   : > { %p975_p6 = pneg %p974_p5 }
 0x259   : > { %p980_p3 = pnand %p979_p8, %p975_p6 }
 0x25b   : > { %983 = shalt.err (!%p980_p3)
}
 0x25c   : > { %797 = dma.vmem_to_hbm [thread:$0]  (%p1167_p9), %s580_s7, 128, %s577_s14, %s551_s10  }
 0x25d   : > { %s354_s1 = scalar_lea.vmem [#allocation8], %s1254_s29  ;;  %s1306_s12 = scalar_lea.hbm %s1359_s4, %s772_s15 }
 0x25e   : > { %s565_s22 = sshll.u32 %s354_s1, 4  ;;  %s546_s16 = scalar_lea.sflag [#allocation4], %s1251_s17  ;;  %s1308_s22 = int_to_ptr.vmem [resolvable:$true] %s565_s22 }
 0x25f   : > { %s984_s26 = scalar_lea.vmem %s1308_s22, 128  ;;  %s1081_s21 = smov [#allocation8]  }
 0x260   : > { %p985_p4 = scmp.ne.s32.totalorder %s1308_s22, %s984_s26  ;;  %s988_s29 = sshll.u32 %s1081_s21, 4  ;;  %s989_s29 = int_to_ptr.vmem [resolvable:$false] %s988_s29 }
 0x261   : > { %s990_s15 = scalar_lea.vmem %s989_s29, 256  ;;  %p991_p12 = scmp.lt.s32.totalorder %s1308_s22, %s989_s29 }
 0x262   : > { %p986_p10 = pnand %p985_p4, %p1167_p9  ;;  %p992_p1 = scmp.lt.s32.totalorder %s990_s15, %s984_s26 }
 0x264   : > { %p987_p13 = pneg %p986_p10  ;;  %p993_p2 = por %p992_p1, %p991_p12 }
 0x266   : > { %p994_p5 = pnand %p993_p2, %p987_p13 }
 0x310   : > { %v539_v21 = vpop.f32.mrf.mxu1 }
 0x311   : > { %544 = vst.msk [vmem:[%s354_s1] sm:$0xff] %vm375_vm1, %v539_v21 }
 0x312   : > { %v789_v22 = vpop.f32.mrf.mxu1 }
 0x313   : > { %997 = shalt.err (!%p994_p5)
}
 0x314   : > { %s998_s14 = scalar_lea.hbm %s1306_s12, 128  ;;  %s1002_s10 = scalar_lea.hbm %s1359_s4, 256 }
 0x315   : > { %p999_p6 = scmp.ne.s32.totalorder %s1306_s12, %s998_s14  ;;  %p1003_p8 = scmp.lt.s32.totalorder %s1306_s12, %s1359_s4 }
 0x316   : > { %p1004_p3 = scmp.lt.s32.totalorder %s1002_s10, %s998_s14 }
 0x317   : > { %p1000_p7 = pnand %p999_p6, %p1167_p9 }
 0x318   : > { %p1005_p4 = por %p1004_p3, %p1003_p8 }
 0x319   : > { %p1001_p0 = pneg %p1000_p7 }
 0x31b   : > { %p1006_p10 = pnand %p1005_p4, %p1001_p0 }
 0x31d   : > { %1009 = shalt.err (!%p1006_p10)
}
 0x31e   : > { %796 = dma.vmem_to_hbm [thread:$0]  (%p1167_p9), %s1308_s22, 128, %s1306_s12, %s546_s16  }
 0x31f PF: > { %s1379_s24 = sld [smem:[#allocation16_spill]]  ;;  %s591_s30 = sand.u32 1, %s1052_s18  }
 0x320   : > { %s592_s13 = scalar_lea.sflag [#allocation4], %s591_s30 }
 0x325   : > { %p1380_p13 = scmp.ge.s32.totalorder %s1379_s24, 2 }
 0x327   : > { %p811_p12 = pnand %p1380_p13, %p1174_p11 }
 0x329   : > { %p812_p1 = pneg %p811_p12 }
 0x32b   : > { %1043 = dma.done.wait (%p812_p1), %s592_s13, 128  }
 0x32c   : > { %1045 = vsyncadd (%p812_p1), %s592_s13, 4294967168  ;;  %s601_s25 = scalar_lea.sflag [#allocation10], %s591_s30 }
 0x32d   : > { %1047 = dma.done.wait (%p812_p1), %s601_s25, 128  }
 0x32e   : > { %1049 = vsyncadd (%p812_p1), %s601_s25, 4294967168  ;;  %s28_s23 = sadd.s32 1, %s1379_s24   ;;  %s1381_s6 = sld [smem:[#allocation18_spill]] }
 0x32f   : > { %p25_p2 = scmp.ge.s32.totalorder %s28_s23, 4   ;;  %s1382_s21 = sld [smem:[#allocation15_spill]] }
 0x330   : > { %s1383_s22 = sld [smem:[#allocation17_spill]]  ;;  %s1384_s18 = smov %s1056_s19 }
 0x331   : > { %s1385_s19 = smov %s1060_s20  ;;  %27 = sbr.rel (!%p25_p2) target bundleno = 12 (0xc), region = 125 }
 0x334   : > { %s1386_s20 = smov %s1381_s6 }
 0x336   :  { %606 = vsyncpa [#allocation3], 1 }
 0x337   :  { %608 = vsyncpa [#allocation3 + $0x1], 1 }
 0x338   :  { %609 = vsyncpa [#allocation6], 1 }
 0x339   :  { %611 = vsyncpa [#allocation6 + $0x1], 1 }
 0x33a   :  { %612 = vsyncpa [#allocation4], 1 }
 0x33b   :  { %614 = vsyncpa [#allocation4 + $0x1], 1 }
 0x33c   :  { %615 = vsyncpa [#allocation10], 1 }
 0x33d   :  { %617 = vsyncpa [#allocation10 + $0x1], 1 }

</bundles_post_ra>
